<compile_context>
chip_gen: v5e
topology: v5e:2x2
jax: 0.10.0
libtpu: 0.0.40
codegen_flags: <defaults>
</compile_context>

<pallas_src>
import functools

import numpy as np
import jax
import jax.numpy as jnp
from jax import lax
from jax.experimental import pallas as pl
from jax.experimental.pallas import tpu as pltpu


def _fused_conv3_kernel(x_ref, w1_ref, b1_ref, w2_ref, b2_ref, mask_ref, o_ref, *, row_stride):
    """Fused (1x3 conv + ReLU) -> (3x1 conv + ReLU) for one image.

    Layout: channels on sublanes, flattened zero-padded spatial frame on lanes.
      x_ref:    (Cin,  S_pad)   S_pad = 128-aligned (H+2)*(W+2) + >=(W+2) zero spacer lanes
      w1_ref:   (3, Cout, Cin)  taps of the 1x3 kernel
      w2_ref:   (3, Cout, Cout) taps of the 3x1 kernel
      b1_ref / b2_ref: (Cout, 1)
      mask_ref: (1, S_pad)  1.0 on interior frame columns, 0.0 on the two W-halo columns and
                on the trailing spacer lanes (these act as conv2's zero padding).
      o_ref:    (Cout, S_pad)   final activation on the same flattened frame.
    """
    n_lanes = x_ref.shape[-1]

    def shift_lanes(v, off):
        # result[:, p] = v[:, (p - off) % n_lanes].  Circular wraps only ever read zero
        # halo/pad lanes (input) or mask-zeroed lanes (y), so they behave like zero fill.
        if off % n_lanes == 0:
            return v
        return pltpu.roll(v, shift=off % n_lanes, axis=1)

    def conv3_relu(v, w_ref, b_ref, step):
        # Tap kt of a 3-wide conv reads v at lane offset (kt - 1) * step.
        acc = None
        for kt in range(3):
            vt = shift_lanes(v, (1 - kt) * step)
            part = lax.dot_general(
                w_ref[kt], vt,                     # (Cout, K) @ (K, S_pad) -> (Cout, S_pad)
                dimension_numbers=(((1,), (0,)), ((), ())),
                preferred_element_type=jnp.float32)
            acc = part if acc is None else acc + part
        return jnp.maximum(acc + b_ref[...], 0.0)

    x = x_ref[...]
    # conv1 (1x3 along W): the zero rows of the padded frame yield relu(b1) rows for free,
    # exactly matching PyTorch's H-padding of conv1.
    y = conv3_relu(x, w1_ref, b1_ref, 1)
    # Zero the two W-halo columns (conv2's W padding) and the trailing spacer lanes (so the
    # +-row_stride rolls of conv2 wrap into zeros across the frame top/bottom).
    y = y * mask_ref[...].astype(y.dtype)
    # conv2 (3x1 along H) == lane shifts by +-row_stride in the flattened frame.
    z = conv3_relu(y, w2_ref, b2_ref, row_stride)
    o_ref[...] = z.astype(o_ref.dtype)


def prepare_new_conv3_params(w1, b1, w2, b2, h, w):
    """One-time preprocessing of PyTorch-layout Conv2d params (hoisted out of the forward)."""
    cout, cin = w1.shape[0], w1.shape[1]
    hp, wp = h + 2, w + 2
    s = hp * wp
    # 128-aligned lane count with at least one frame row (wp lanes) of zero spacer so the
    # circular +-wp rolls of conv2 wrap into mask-zeroed lanes.
    s_pad = (s + wp + 127) // 128 * 128
    assert s_pad - s >= wp

    w1k = jnp.transpose(w1[:, :, 0, :], (2, 0, 1))      # (3, Cout, Cin)
    w2k = jnp.transpose(w2[:, :, :, 0], (2, 0, 1))      # (3, Cout, Cout)
    b1c = b1.reshape(cout, 1)
    b2c = b2.reshape(cout, 1)

    col = np.arange(s_pad)
    valid = (col < s) & (col % wp != 0) & (col % wp != wp - 1)
    mask = jnp.asarray(valid.astype(np.float32)).reshape(1, s_pad)
    return w1k, b1c, w2k, b2c, mask


def new_conv3_forward(x, w1k, b1c, w2k, b2c, mask):
    """x: (N, Cin, H, W) NCHW.  Returns (N, Cout, H+2, W+2) matching PyTorch New_conv3."""
    n, cin, h, w = x.shape
    cout = w1k.shape[1]
    hp, wp = h + 2, w + 2
    s = hp * wp
    s_pad = mask.shape[-1]

    # Single small pad of the input: provides conv1's W halo and its "bias rows", defines the
    # flattened (H+2)x(W+2) frame, and appends the 128-aligned zero spacer lanes.
    xp = jnp.pad(x, ((0, 0), (0, 0), (1, 1), (1, 1))).reshape(n, cin, s)
    xp = jnp.pad(xp, ((0, 0), (0, 0), (0, s_pad - s)))

    out_flat = pl.pallas_call(
        functools.partial(_fused_conv3_kernel, row_stride=wp),
        out_shape=jax.ShapeDtypeStruct((n, cout, s_pad), x.dtype),
        grid=(n,),
        in_specs=[
            pl.BlockSpec((None, cin, s_pad), lambda i: (i, 0, 0)),
            pl.BlockSpec((3, cout, cin), lambda i: (0, 0, 0)),
            pl.BlockSpec((cout, 1), lambda i: (0, 0)),
            pl.BlockSpec((3, cout, cout), lambda i: (0, 0, 0)),
            pl.BlockSpec((cout, 1), lambda i: (0, 0)),
            pl.BlockSpec((1, s_pad), lambda i: (0, 0)),
        ],
        out_specs=pl.BlockSpec((None, cout, s_pad), lambda i: (i, 0, 0)),
        compiler_params=pltpu.CompilerParams(
            dimension_semantics=("parallel",)),
    )(xp, w1k, b1c, w2k, b2c, mask)

    return out_flat[..., :s].reshape(n, cout, hp, wp)


def _torch_conv_ref(x, w, b, pad):
    out = lax.conv_general_dilated(
        x, w, window_strides=(1, 1),
        padding=((pad, pad), (pad, pad)),
        dimension_numbers=("NCHW", "OIHW", "NCHW"))
    return out + b[None, :, None, None]


if __name__ == "__main__":
    key = jax.random.PRNGKey(0)
    k1, k2, k3, k4, kx = jax.random.split(key, 5)

    N, IN_CH, OUT_CH, H, W = 2, 4, 8, 16, 16

    # Deterministic synthetic parameters (PyTorch Conv2d weight/bias shapes).
    w1 = jax.random.normal(k1, (OUT_CH, IN_CH, 1, 3), jnp.float32) * 0.1
    b1 = jax.random.normal(k2, (OUT_CH,), jnp.float32) * 0.1
    w2 = jax.random.normal(k3, (OUT_CH, OUT_CH, 3, 1), jnp.float32) * 0.1
    b2 = jax.random.normal(k4, (OUT_CH,), jnp.float32) * 0.1

    x = jax.random.normal(kx, (N, IN_CH, H, W), jnp.float32)

    # One-time parameter prep (out of the per-call path), then the jitted fused forward.
    params = prepare_new_conv3_params(w1, b1, w2, b2, H, W)
    fwd = jax.jit(new_conv3_forward)
    out = jax.block_until_ready(fwd(x, *params))
    assert out.shape == (N, OUT_CH, H + 2, W + 2), out.shape

    # Pure-JAX reference (same semantics as the PyTorch module).
    ref = jnp.maximum(_torch_conv_ref(x, w1, b1, 1), 0.0)
    ref = jnp.maximum(_torch_conv_ref(ref, w2, b2, 1), 0.0)
    err = float(jnp.max(jnp.abs(out - ref)))
    assert jnp.allclose(out, ref, atol=1e-5, rtol=1e-5), err

    print("KERNEL_OK")
</pallas_src>

<mosaic_0001>
module attributes {stable_mosaic.version = 11 : i64} {
  func.func @_fused_conv3_kernel(%arg0: i32, %arg1: memref<1x4x384xf32, #tpu.memory_space<vmem>>, %arg2: memref<3x8x4xf32, #tpu.memory_space<vmem>>, %arg3: memref<8x1xf32, #tpu.memory_space<vmem>>, %arg4: memref<3x8x8xf32, #tpu.memory_space<vmem>>, %arg5: memref<8x1xf32, #tpu.memory_space<vmem>>, %arg6: memref<1x384xf32, #tpu.memory_space<vmem>>, %arg7: memref<1x8x384xf32, #tpu.memory_space<vmem>>) attributes {dimension_semantics = [#tpu.dimension_semantics<parallel>], iteration_bounds = array<i64: 2>, scalar_prefetch = 0 : i64, scratch_operands = 0 : i64, tpu.core_type = #tpu.core_type<tc>, window_params = [{transform_indices = @transform_0, window_bounds = array<i64: 1, 4, 384>}, {pipeline_mode = #tpu.pipeline_mode<synchronous>, transform_indices = @transform_1, window_bounds = array<i64: 3, 8, 4>}, {pipeline_mode = #tpu.pipeline_mode<synchronous>, transform_indices = @transform_2, window_bounds = array<i64: 8, 1>}, {pipeline_mode = #tpu.pipeline_mode<synchronous>, transform_indices = @transform_3, window_bounds = array<i64: 3, 8, 8>}, {pipeline_mode = #tpu.pipeline_mode<synchronous>, transform_indices = @transform_4, window_bounds = array<i64: 8, 1>}, {pipeline_mode = #tpu.pipeline_mode<synchronous>, transform_indices = @transform_5, window_bounds = array<i64: 1, 384>}, {transform_indices = @transform_6, window_bounds = array<i64: 1, 8, 384>}]} {
    %c0 = arith.constant 0 : index
    %c0_0 = arith.constant 0 : index
    %c0_1 = arith.constant 0 : index
    %0 = vector.load %arg1[%c0, %c0_0, %c0_1] : memref<1x4x384xf32, #tpu.memory_space<vmem>>, vector<1x4x384xf32>
    %1 = vector.shape_cast %0 : vector<1x4x384xf32> to vector<4x384xf32>
    %c1_i32 = arith.constant 1 : i32
    %2 = tpu.dynamic_rotate %1 by %c1_i32 dim 1 : vector<4x384xf32>, i32 -> vector<4x384xf32>
    %c0_2 = arith.constant 0 : index
    %c0_3 = arith.constant 0 : index
    %c0_4 = arith.constant 0 : index
    %3 = vector.load %arg2[%c0_2, %c0_3, %c0_4] : memref<3x8x4xf32, #tpu.memory_space<vmem>>, vector<1x8x4xf32>
    %4 = vector.shape_cast %3 : vector<1x8x4xf32> to vector<8x4xf32>
    %cst = arith.constant dense<0.000000e+00> : vector<8x384xf32>
    %5 = tpu.matmul %4, %2, %cst {dimension_numbers = #tpu.dot_dimension_numbers<[1], [0], [0], [1], [0, 0, 1, 1], [], []>} : vector<8x4xf32>, vector<4x384xf32>, vector<8x384xf32> -> vector<8x384xf32>
    %c1 = arith.constant 1 : index
    %c0_5 = arith.constant 0 : index
    %c0_6 = arith.constant 0 : index
    %6 = vector.load %arg2[%c1, %c0_5, %c0_6] : memref<3x8x4xf32, #tpu.memory_space<vmem>>, vector<1x8x4xf32>
    %7 = vector.shape_cast %6 : vector<1x8x4xf32> to vector<8x4xf32>
    %cst_7 = arith.constant dense<0.000000e+00> : vector<8x384xf32>
    %8 = tpu.matmul %7, %1, %cst_7 {dimension_numbers = #tpu.dot_dimension_numbers<[1], [0], [0], [1], [0, 0, 1, 1], [], []>} : vector<8x4xf32>, vector<4x384xf32>, vector<8x384xf32> -> vector<8x384xf32>
    %9 = arith.addf %5, %8 : vector<8x384xf32>
    %c383_i32 = arith.constant 383 : i32
    %10 = tpu.dynamic_rotate %1 by %c383_i32 dim 1 : vector<4x384xf32>, i32 -> vector<4x384xf32>
    %c2 = arith.constant 2 : index
    %c0_8 = arith.constant 0 : index
    %c0_9 = arith.constant 0 : index
    %11 = vector.load %arg2[%c2, %c0_8, %c0_9] : memref<3x8x4xf32, #tpu.memory_space<vmem>>, vector<1x8x4xf32>
    %12 = vector.shape_cast %11 : vector<1x8x4xf32> to vector<8x4xf32>
    %cst_10 = arith.constant dense<0.000000e+00> : vector<8x384xf32>
    %13 = tpu.matmul %12, %10, %cst_10 {dimension_numbers = #tpu.dot_dimension_numbers<[1], [0], [0], [1], [0, 0, 1, 1], [], []>} : vector<8x4xf32>, vector<4x384xf32>, vector<8x384xf32> -> vector<8x384xf32>
    %14 = arith.addf %9, %13 : vector<8x384xf32>
    %c0_11 = arith.constant 0 : index
    %c0_12 = arith.constant 0 : index
    %15 = vector.load %arg3[%c0_11, %c0_12] : memref<8x1xf32, #tpu.memory_space<vmem>>, vector<8x1xf32>
    %16 = vector.broadcast %15 : vector<8x1xf32> to vector<8x384xf32>
    %17 = arith.addf %14, %16 : vector<8x384xf32>
    %cst_13 = arith.constant 0.000000e+00 : f32
    %18 = vector.broadcast %cst_13 : f32 to vector<8x384xf32>
    %19 = arith.maximumf %17, %18 : vector<8x384xf32>
    %c0_14 = arith.constant 0 : index
    %c0_15 = arith.constant 0 : index
    %20 = vector.load %arg6[%c0_14, %c0_15] : memref<1x384xf32, #tpu.memory_space<vmem>>, vector<1x384xf32>
    %21 = vector.broadcast %20 : vector<1x384xf32> to vector<8x384xf32>
    %22 = arith.mulf %19, %21 : vector<8x384xf32>
    %c18_i32 = arith.constant 18 : i32
    %23 = tpu.dynamic_rotate %22 by %c18_i32 dim 1 : vector<8x384xf32>, i32 -> vector<8x384xf32>
    %c0_16 = arith.constant 0 : index
    %c0_17 = arith.constant 0 : index
    %c0_18 = arith.constant 0 : index
    %24 = vector.load %arg4[%c0_16, %c0_17, %c0_18] : memref<3x8x8xf32, #tpu.memory_space<vmem>>, vector<1x8x8xf32>
    %25 = vector.shape_cast %24 : vector<1x8x8xf32> to vector<8x8xf32>
    %cst_19 = arith.constant dense<0.000000e+00> : vector<8x384xf32>
    %26 = tpu.matmul %25, %23, %cst_19 {dimension_numbers = #tpu.dot_dimension_numbers<[1], [0], [0], [1], [0, 0, 1, 1], [], []>} : vector<8x8xf32>, vector<8x384xf32>, vector<8x384xf32> -> vector<8x384xf32>
    %c1_20 = arith.constant 1 : index
    %c0_21 = arith.constant 0 : index
    %c0_22 = arith.constant 0 : index
    %27 = vector.load %arg4[%c1_20, %c0_21, %c0_22] : memref<3x8x8xf32, #tpu.memory_space<vmem>>, vector<1x8x8xf32>
    %28 = vector.shape_cast %27 : vector<1x8x8xf32> to vector<8x8xf32>
    %cst_23 = arith.constant dense<0.000000e+00> : vector<8x384xf32>
    %29 = tpu.matmul %28, %22, %cst_23 {dimension_numbers = #tpu.dot_dimension_numbers<[1], [0], [0], [1], [0, 0, 1, 1], [], []>} : vector<8x8xf32>, vector<8x384xf32>, vector<8x384xf32> -> vector<8x384xf32>
    %30 = arith.addf %26, %29 : vector<8x384xf32>
    %c366_i32 = arith.constant 366 : i32
    %31 = tpu.dynamic_rotate %22 by %c366_i32 dim 1 : vector<8x384xf32>, i32 -> vector<8x384xf32>
    %c2_24 = arith.constant 2 : index
    %c0_25 = arith.constant 0 : index
    %c0_26 = arith.constant 0 : index
    %32 = vector.load %arg4[%c2_24, %c0_25, %c0_26] : memref<3x8x8xf32, #tpu.memory_space<vmem>>, vector<1x8x8xf32>
    %33 = vector.shape_cast %32 : vector<1x8x8xf32> to vector<8x8xf32>
    %cst_27 = arith.constant dense<0.000000e+00> : vector<8x384xf32>
    %34 = tpu.matmul %33, %31, %cst_27 {dimension_numbers = #tpu.dot_dimension_numbers<[1], [0], [0], [1], [0, 0, 1, 1], [], []>} : vector<8x8xf32>, vector<8x384xf32>, vector<8x384xf32> -> vector<8x384xf32>
    %35 = arith.addf %30, %34 : vector<8x384xf32>
    %c0_28 = arith.constant 0 : index
    %c0_29 = arith.constant 0 : index
    %36 = vector.load %arg5[%c0_28, %c0_29] : memref<8x1xf32, #tpu.memory_space<vmem>>, vector<8x1xf32>
    %37 = vector.broadcast %36 : vector<8x1xf32> to vector<8x384xf32>
    %38 = arith.addf %35, %37 : vector<8x384xf32>
    %cst_30 = arith.constant 0.000000e+00 : f32
    %39 = vector.broadcast %cst_30 : f32 to vector<8x384xf32>
    %40 = arith.maximumf %38, %39 : vector<8x384xf32>
    %c0_31 = arith.constant 0 : index
    %c0_32 = arith.constant 0 : index
    %c0_33 = arith.constant 0 : index
    %41 = vector.load %arg7[%c0_31, %c0_32, %c0_33] : memref<1x8x384xf32, #tpu.memory_space<vmem>>, vector<1x8x384xf32>
    %42 = vector.shape_cast %41 : vector<1x8x384xf32> to vector<8x384xf32>
    %43 = vector.shape_cast %40 : vector<8x384xf32> to vector<1x8x384xf32>
    tpu.vector_store %arg7[%c0_31, %c0_32, %c0_33], %43 {strides = array<i32>} : memref<1x8x384xf32, #tpu.memory_space<vmem>>, vector<1x8x384xf32>,
    return
  }
  func.func @transform_0(%arg0: i32) -> (i32, i32, i32) {
    %c0_i32 = arith.constant 0 : i32
    %c0_i32_0 = arith.constant 0 : i32
    %c0_i32_1 = arith.constant 0 : i32
    return %arg0, %c0_i32, %c0_i32_0 : i32, i32, i32
  }
  func.func @transform_1(%arg0: i32) -> (i32, i32, i32) {
    %c0_i32 = arith.constant 0 : i32
    %c0_i32_0 = arith.constant 0 : i32
    %c0_i32_1 = arith.constant 0 : i32
    %c0_i32_2 = arith.constant 0 : i32
    return %c0_i32, %c0_i32_0, %c0_i32_1 : i32, i32, i32
  }
  func.func @transform_2(%arg0: i32) -> (i32, i32) {
    %c0_i32 = arith.constant 0 : i32
    %c0_i32_0 = arith.constant 0 : i32
    %c0_i32_1 = arith.constant 0 : i32
    return %c0_i32, %c0_i32_0 : i32, i32
  }
  func.func @transform_3(%arg0: i32) -> (i32, i32, i32) {
    %c0_i32 = arith.constant 0 : i32
    %c0_i32_0 = arith.constant 0 : i32
    %c0_i32_1 = arith.constant 0 : i32
    %c0_i32_2 = arith.constant 0 : i32
    return %c0_i32, %c0_i32_0, %c0_i32_1 : i32, i32, i32
  }
  func.func @transform_4(%arg0: i32) -> (i32, i32) {
    %c0_i32 = arith.constant 0 : i32
    %c0_i32_0 = arith.constant 0 : i32
    %c0_i32_1 = arith.constant 0 : i32
    return %c0_i32, %c0_i32_0 : i32, i32
  }
  func.func @transform_5(%arg0: i32) -> (i32, i32) {
    %c0_i32 = arith.constant 0 : i32
    %c0_i32_0 = arith.constant 0 : i32
    %c0_i32_1 = arith.constant 0 : i32
    return %c0_i32, %c0_i32_0 : i32, i32
  }
  func.func @transform_6(%arg0: i32) -> (i32, i32, i32) {
    %c0_i32 = arith.constant 0 : i32
    %c0_i32_0 = arith.constant 0 : i32
    %c0_i32_1 = arith.constant 0 : i32
    return %arg0, %c0_i32, %c0_i32_0 : i32, i32, i32
  }
}

</mosaic_0001>

<bundles_post_ra>
// kernel: new_conv3_forward.1
= control target key start
LH: loop header
LB: loop body
LE: loop exit
PB: predicated region body
PF: predicated region fallthrough
CT: control target
= control target key end

     0   :  { %s950_s21 = smov 0   ;;  %s1031_s0 = inlined_call_operand.vmem [shape: f32[2,4,384], index: 0, kind: input, shape index: {}]   ;;  %s1032_s1 = inlined_call_operand.vmem [shape: f32[3,8,4], index: 1, kind: input, shape index: {}]   ;;  %s1033_s2 = inlined_call_operand.vmem [shape: f32[8,1], index: 2, kind: input, shape index: {}]   ;;  %s1034_s3 = inlined_call_operand.vmem [shape: f32[3,8,8], index: 3, kind: input, shape index: {}]   ;;  %s1035_s4 = inlined_call_operand.vmem [shape: f32[8,1], index: 4, kind: input, shape index: {}]   ;;  %s1036_s5 = inlined_call_operand.vmem [shape: f32[1,384], index: 5, kind: input, shape index: {}]   ;;  %s1037_s6 = inlined_call_operand.vmem [shape: f32[2,8,384], index: 6, kind: output, shape index: {}]  }
   0x1 LB: > { %s836_s22 = sadd.s32 4294967295, %s908_s21   ;;  %p840_p0 = scmp.ge.s32.totalorder %s908_s21, 1  ;;  %s908_s21 = sphi %s950_s21, %s16_s21  }
   0x2   : > { %p212_p1 = scmp.lt.s32.totalorder %s908_s21, 3 }
   0x4   : > { %p213_p2 = pnand %p840_p0, %p212_p1 }
   0x5   : > { %p242_p3 = scmp.lt.s32.totalorder (!%p213_p2), %s836_s22, 1  ;;  %s910_s27 = smov (!%p213_p2), 1  }
   0x6   : > { %216 = sbr.rel (%p213_p2) target bundleno = 565 (0x235), region = 44  ;;  %s911_s28 = smov (!%p213_p2), 127  }
   0x7   : > { %s913_s17 = smov (!%p213_p2), 18   ;;  %s914_s18 = smov (!%p213_p2), 110  }
   0xb   : > { %s1039_s22 = smov (!%p242_p3, %s836_s22), 1  ;;  %vm290_vm0 = vcmask 1043456   ;;  %v843_v11 = vld [vmem:[%s1032_s1 + $0x8] sm:$0xff]  ;;  %vm286_vm1 = vcmask 31744   ;;  %v525_v12 = vld [vmem:[%s1033_s2] sm:$0xff]  ;;  %v912_v13 = vmov 0   ;;  %v271_v14 = vlaneseq }
   0xc   : > { %s876_s23 = smul.u32 12, %s1039_s22  ;;  %891 = vset.pattern.permute.xlu0 %v912_v13  ;;  %v766_v16 = vld [vmem:[%s1035_s4] sm:$0xff]  ;;  %v856_v28 = vld [vmem:[%s1032_s1 + $0x10] sm:$0xff]  ;;  %v863_v61 = vld [vmem:[%s1034_s3 + $0x8] sm:$0xff]  ;;  %vm561_vm4 = vcmask 64512  }
   0xd   : > { %v976_v15 = vand.u32 127, %v271_v14  ;;  %v277_v20 = vld [vmem:[%s1032_s1] sm:$0xff] }
   0xe   : > { %s246_s26 = scalar_lea.vmem %s1031_s0, %s876_s23  ;;  %v537_v39 = vld [vmem:[%s1036_s5] sm:$0x7] }
   0xf   : > { %v252_v0 = vld [vmem:[%s246_s26] sm:$0xff]  ;;  %v253_v1 = vld [vmem:[%s246_s26 + $0x8] sm:$0xf]  ;;  %vm273_vm2 = vcmp.lt.s32.totalorder %v976_v15, 1  ;;  %vm444_vm3 = vcmp.lt.s32.totalorder %v976_v15, 127  ;;  %v541_v44 = vperm.slane %v537_v39, 2 }
  0x10   : > { %256 = vst [vmem:[#allocation1] ss:$2 sm:$0xff] %v252_v0  ;;  %v539_v53 = vperm.slane %v537_v39, 0  ;;  %v540_v55 = vperm.slane %v537_v39, 1  ;;  %vm554_vm5 = vcmp.lt.s32.totalorder %v976_v15, 18  ;;  %vm694_vm6 = vcmp.lt.s32.totalorder %v976_v15, 110 }
  0x11   : > { %258 = vst [vmem:[#allocation1 + $0x10] ss:$2 sm:$0xff] %v253_v1 }
  0x17   : > { %v260_v2 = vld.sshfl [vmem:[#allocation1 + $0x8] sm:$0xff pattern:$0x75316420]  ;;  %v259_v3 = vld.sshfl [vmem:[#allocation1] sm:$0xff pattern:$0x75316420] }
  0x18   : > { %267 = vrot.lane.b32.xlu1 %v260_v2, %s910_s27  ;;  %265 = vrot.lane.b32.xlu0 %v259_v3, %s910_s27  ;;  %280 = vst [vmem:[#allocation1] ss:$2 sm:$0xff] %v252_v0  ;;  %v261_v4 = vld.sshfl [vmem:[#allocation1 + $0x10] sm:$0xff pattern:$0x75316420]  ;;  %v558_v2 = vld [vmem:[%s1034_s3] sm:$0xff] }
  0x19   : > { %282 = vst [vmem:[#allocation1 + $0x10] ss:$2 sm:$0xff] %v253_v1 }
  0x1f   : > { %v283_v5 = vld.sshfl [vmem:[#allocation1] sm:$0xff pattern:$0x75316420]  ;;  %v284_v6 = vld.sshfl [vmem:[#allocation1 + $0x8] sm:$0xff pattern:$0x75316420] }
  0x20   : > { %429 = vst [vmem:[#allocation1] ss:$2 sm:$0xff] %v252_v0  ;;  %v285_v7 = vld.sshfl [vmem:[#allocation1 + $0x10] sm:$0xff pattern:$0x75316420]  ;;  %269 = vrot.lane.b32.xlu0 %v261_v4, %s910_s27  ;;  %844 = vmatpush.msk.msra.mxu0 %vm290_vm0, %v283_v5  ;;  %s877_s27 = smul.u32 24, %s1039_s22 }
  0x21   : > { %431 = vst [vmem:[#allocation1 + $0x10] ss:$2 sm:$0xff] %v253_v1  ;;  %846 = vmatpush.msk.msra.mxu1 %vm290_vm0, %v284_v6  ;;  %848 = vmatpush.msk.msra.mxu2 %vm290_vm0, %v285_v7 }
  0x22   : > { %845 = vmatmul.msk.f32.vlgmr.msra.gmra.mxu0 %vm286_vm1, %v843_v11  ;;  %847 = vmatmul.msk.f32.vlgmr.msra.gmra.mxu1 %vm286_vm1, %v843_v11  ;;  %s251_s30 = scalar_lea.vmem %s1037_s6, %s877_s27 }
  0x23   : > { %849 = vmatmul.msk.f32.vlgmr.msra.gmra.mxu2 %vm286_vm1, %v843_v11 }
  0x27   : > { %v432_v8 = vld.sshfl [vmem:[#allocation1] sm:$0xff pattern:$0x75316420]  ;;  %v433_v9 = vld.sshfl [vmem:[#allocation1 + $0x8] sm:$0xff pattern:$0x75316420] }
  0x28   : > { %438 = vrot.lane.b32.xlu1 %v432_v8, %s911_s28  ;;  %440 = vrot.lane.b32.xlu2 %v433_v9, %s911_s28  ;;  %v434_v10 = vld.sshfl [vmem:[#allocation1 + $0x10] sm:$0xff pattern:$0x75316420] }
  0x29   : > { %528 = vperm.xlu0 %891, %v525_v12  }
  0x30   : > { %442 = vrot.lane.b32.xlu2 %v434_v10, %s911_s28  ;;  %v870_v10 = vld [vmem:[%s1034_s3 + $0x10] sm:$0xff] }
  0x31   : > { %769 = vperm.xlu0 %891, %v766_v16  }
  0x82   : > { %v441_v17 = vpop.permute.xlu2 %440 }
  0x8a   : > { %v268_v18 = vpop.permute.xlu1 %267  ;;  %v266_v19 = vpop.permute.xlu0 %265 }
  0x8b   : > { %v275_v21 = vsel %vm273_vm2, %v266_v19, %v268_v18  ;;  %v443_v22 = vpop.permute.xlu2 %442 }
  0x8c   : > { %852 = vmatpush.msk.msrb.mxu0 %vm290_vm0, %v275_v21  ;;  %v445_v26 = vsel %vm444_vm3, %v441_v17, %v443_v22 }
  0x8d   : > { %853 = vmatmul.msk.f32.vlgmr.msrb.gmra.mxu0 %vm286_vm1, %v277_v20 }
  0x92   : > { %v270_v23 = vpop.permute.xlu0 %269 }
  0x93   : > { %v276_v24 = vsel %vm273_vm2, %v270_v23, %v266_v19  ;;  %v274_v25 = vsel %vm273_vm2, %v268_v18, %v270_v23 }
  0x94   : > { %850 = vmatpush.msk.msra.mxu3 %vm290_vm0, %v276_v24  ;;  %854 = vmatpush.msk.msrb.mxu1 %vm290_vm0, %v274_v25 }
  0x95   : > { %851 = vmatmul.msk.f32.vlgmr.msra.gmra.mxu3 %vm286_vm1, %v277_v20  ;;  %855 = vmatmul.msk.f32.vlgmr.msrb.gmra.mxu1 %vm286_vm1, %v277_v20 }
  0x96   : > { %859 = vmatpush.msk.msrb.mxu3 %vm290_vm0, %v445_v26 }
  0x9a   : > { %v439_v27 = vpop.permute.xlu1 %438 }
  0x9b   : > { %v447_v29 = vsel %vm444_vm3, %v443_v22, %v439_v27  ;;  %v446_v30 = vsel %vm444_vm3, %v439_v27, %v441_v17  ;;  %v529_v42 = vpop.permute.xlu0 %528 }
  0x9c   : > { %857 = vmatpush.msk.msrb.mxu2 %vm290_vm0, %v446_v30  ;;  %861 = vmatpush.msk.msra.mxu0 %vm290_vm0, %v447_v29 }
  0x9d   : > { %858 = vmatmul.msk.f32.vlgmr.msrb.gmra.mxu2 %vm286_vm1, %v856_v28  ;;  %860 = vmatmul.msk.f32.vlgmr.msrb.gmra.mxu3 %vm286_vm1, %v856_v28 }
  0x9e   : > { %862 = vmatmul.msk.f32.vlgmr.msra.gmra.mxu0 %vm286_vm1, %v856_v28 }
  0x9f   : > { %v314_v31 = vpop.f32.mrf.mxu0  ;;  %v334_v32 = vpop.f32.mrf.mxu1 }
  0xa3   : > { %v770_v26 = vpop.permute.xlu0 %769 }
  0xa6   : > { %v354_v34 = vpop.f32.mrf.mxu2 }
 0x10a   : > { %v406_v33 = vpop.f32.mrf.mxu0 }
 0x10b   : > { %v407_v41 = vadd.f32 %v406_v33, %v334_v32 }
 0x112   : > { %v426_v35 = vpop.f32.mrf.mxu1 }
 0x113   : > { %v427_v37 = vadd.f32 %v426_v35, %v354_v34 }
 0x118   : > { %v386_v36 = vpop.f32.mrf.mxu3 }
 0x119   : > { %v387_v45 = vadd.f32 %v386_v36, %v314_v31 }
 0x11b   : > { %v519_v38 = vpop.f32.mrf.mxu0 }
 0x11c   : > { %v524_v40 = vadd.f32 %v519_v38, %v427_v37 }
 0x11e   : > { %v533_v43 = vadd.f32 %v529_v42, %v524_v40 }
 0x120   : > { %v536_v46 = vmax.f32 %v533_v43, 0.0  ;;  %v479_v47 = vpop.f32.mrf.mxu2  ;;  %v499_v48 = vpop.f32.mrf.mxu3 }
 0x121   : > { %v522_v49 = vadd.f32 %v479_v47, %v387_v45  ;;  %v523_v50 = vadd.f32 %v499_v48, %v407_v41 }
 0x122   : > { %v547_v51 = vmul.f32 %v541_v44, %v536_v46 }
 0x123   : > { %v531_v52 = vadd.f32 %v529_v42, %v522_v49  ;;  %v532_v54 = vadd.f32 %v529_v42, %v523_v50 }
 0x124   : > { %552 = vrot.lane.b32.xlu2 %v547_v51, %s913_s17  ;;  %620 = vmatpush.msra.mxu3 %v547_v51 }
 0x125   : > { %v534_v56 = vmax.f32 %v531_v52, 0.0  ;;  %v535_v57 = vmax.f32 %v532_v54, 0.0  ;;  %866 = vmatmul.msk.f32.vlgmr.msra.gmra.mxu3 %vm561_vm4, %v863_v61 }
 0x127   : > { %v545_v58 = vmul.f32 %v539_v53, %v534_v56  ;;  %v546_v59 = vmul.f32 %v540_v55, %v535_v57 }
 0x129   : > { %580 = vmatpush.msra.mxu1 %v545_v58  ;;  %600 = vmatpush.msra.mxu2 %v546_v59  ;;  %v892_v60 = vpack.i.bf16 %v546_v59, %v545_v58 }
 0x12a   : > { %864 = vmatmul.msk.f32.vlgmr.msra.gmra.mxu1 %vm561_vm4, %v863_v61  ;;  %865 = vmatmul.msk.f32.vlgmr.msra.gmra.mxu2 %vm561_vm4, %v863_v61 }
 0x12b   : > { %893 = vrot.lane.b32.xlu1 %v892_v60, %s913_s17 }
 0x12c   : > { %692 = vrot.lane.b32.xlu2 %v547_v51, %s914_s18 }
 0x133   : > { %898 = vrot.lane.b32.xlu1 %v892_v60, %s914_s18 }
 0x17e   : > { %v553_v62 = vpop.permute.xlu2 %552 }
 0x186   : > { %v693_v9 = vpop.permute.xlu2 %692 }
 0x19d   : > { %v894_v63 = vpop.permute.xlu1 %893 }
 0x19e   : > { %v896_v0 = vunpack.i.h.bf16 %v894_v63  ;;  %v895_v1 = vunpack.i.l.bf16 %v894_v63 }
 0x1a0   : > { %v557_v3 = vsel %vm554_vm5, %v553_v62, %v895_v1  ;;  %v556_v4 = vsel %vm554_vm5, %v895_v1, %v896_v0  ;;  %v555_v5 = vsel %vm554_vm5, %v896_v0, %v553_v62 }
 0x1a1   : > { %643 = vmatpush.msrb.mxu0 %v557_v3  ;;  %663 = vmatpush.msrb.mxu1 %v556_v4 }
 0x1a2   : > { %683 = vmatpush.msrb.mxu2 %v555_v5  ;;  %867 = vmatmul.msk.f32.vlgmr.msrb.gmra.mxu0 %vm561_vm4, %v558_v2 }
 0x1a3   : > { %868 = vmatmul.msk.f32.vlgmr.msrb.gmra.mxu1 %vm561_vm4, %v558_v2  ;;  %869 = vmatmul.msk.f32.vlgmr.msrb.gmra.mxu2 %vm561_vm4, %v558_v2 }
 0x1a5   : > { %v899_v6 = vpop.permute.xlu1 %898 }
 0x1a6   : > { %v901_v7 = vunpack.i.h.bf16 %v899_v6  ;;  %v900_v8 = vunpack.i.l.bf16 %v899_v6 }
 0x1a7   : > { %v582_v14 = vpop.f32.mrf.mxu1 }
 0x1a8   : > { %v696_v11 = vsel %vm694_vm6, %v900_v8, %v901_v7  ;;  %v695_v12 = vsel %vm694_vm6, %v901_v7, %v693_v9  ;;  %v697_v13 = vsel %vm694_vm6, %v693_v9, %v900_v8  ;;  %v622_v18 = vpop.f32.mrf.mxu3 }
 0x1a9   : > { %718 = vmatpush.msrb.mxu3 %v696_v11  ;;  %738 = vmatpush.msra.mxu0 %v695_v12 }
 0x1aa   : > { %758 = vmatpush.msra.mxu1 %v697_v13  ;;  %871 = vmatmul.msk.f32.vlgmr.msrb.gmra.mxu3 %vm561_vm4, %v870_v10 }
 0x1ab   : > { %872 = vmatmul.msk.f32.vlgmr.msra.gmra.mxu0 %vm561_vm4, %v870_v10  ;;  %873 = vmatmul.msk.f32.vlgmr.msra.gmra.mxu1 %vm561_vm4, %v870_v10 }
 0x1ad   : > { %v602_v15 = vpop.f32.mrf.mxu2 }
 0x21f   : > { %v645_v16 = vpop.f32.mrf.mxu0 }
 0x220   : > { %v665_v17 = vpop.f32.mrf.mxu1  ;;  %v646_v29 = vadd.f32 %v645_v16, %v582_v14 }
 0x221   : > { %v666_v20 = vadd.f32 %v665_v17, %v602_v15 }
 0x226   : > { %v685_v19 = vpop.f32.mrf.mxu2 }
 0x227   : > { %v686_v21 = vadd.f32 %v685_v19, %v622_v18 }
 0x228   : > { %v740_v22 = vpop.f32.mrf.mxu0  ;;  %v760_v23 = vpop.f32.mrf.mxu1 }
 0x229   : > { %v764_v24 = vadd.f32 %v740_v22, %v666_v20  ;;  %v765_v25 = vadd.f32 %v760_v23, %v686_v21 }
 0x22b   : > { %v773_v27 = vadd.f32 %v770_v26, %v764_v24  ;;  %v774_v28 = vadd.f32 %v770_v26, %v765_v25 }
 0x22d   : > { %v776_v30 = vmax.f32 %v773_v27, 0.0  ;;  %v777_v31 = vmax.f32 %v774_v28, 0.0  ;;  %v720_v32 = vpop.f32.mrf.mxu3 }
 0x22e   : > { %v763_v33 = vadd.f32 %v720_v32, %v646_v29 }
 0x22f   : > { %779 = vst [vmem:[%s251_s30 + $0x8] sm:$0xff] %v776_v30 }
 0x230   : > { %780 = vst [vmem:[%s251_s30 + $0x10] sm:$0xff] %v777_v31  ;;  %v772_v34 = vadd.f32 %v770_v26, %v763_v33 }
 0x232   : > { %v775_v35 = vmax.f32 %v772_v34, 0.0 }
 0x234   : > { %778 = vst [vmem:[%s251_s30] sm:$0xff] %v775_v35 }
 0x235 PF: > { %s16_s21 = sadd.s32 1, %s908_s21  }
 0x236   : > { %p13_p4 = scmp.ge.s32.totalorder %s16_s21, 4  }
 0x238   :  { %15 = sbr.rel (!%p13_p4) target bundleno = 1 (0x1), region = 81 }

</bundles_post_ra>
